<compile_context>
chip_gen: v5e
topology: v5e:2x2
jax: 0.10.0
libtpu: 0.0.40
codegen_flags: <defaults>
</compile_context>

<pallas_src>
import jax
import jax.numpy as jnp
from jax.experimental import pallas as pl
from jax.experimental.pallas import tpu as pltpu

LANES = 128                 # vreg lane width (last dim must be lane-dense)
SUBLANES = 8                # f32 sublane tiling
ALIGN = SUBLANES * LANES    # 1024: granularity of the no-pad fast path
MAX_TILE_ROWS = 8192        # 8192 x 128 x 4B = 4 MiB per f32 block
MIN_TILE_ROWS = 512         # 256 KiB floor; below this per-step overhead dominates
MIN_GRID_STEPS = 8          # keep >= ~4 steps per TensorCore on v7x's 2 cores


def scale_bias_kernel(x_ref, w_ref, b_ref, o_ref):
    # x_ref / o_ref: (tile_rows, 128) VMEM blocks.
    # w_ref / b_ref: (1, 1) SMEM scalars.
    w = w_ref[0, 0]
    b = b_ref[0, 0]
    o_ref[...] = x_ref[...] * w + b   # single VPU fused mul-add per vreg


def _round_up(a, m):
    return ((a + m - 1) // m) * m


def _pick_tile_rows(rows):
    # Biggest block (<= 4 MiB) that still leaves a few grid steps for the
    # v7x megacore; never below the 256 KiB floor, never bigger than the array.
    target = _round_up(max(1, -(-rows // MIN_GRID_STEPS)), SUBLANES)
    tile = max(MIN_TILE_ROWS, min(MAX_TILE_ROWS, target))
    return min(tile, rows)


@jax.jit
def feedforward_nn(x, weight, bias):
    """x: (B, 1) f32; weight: (1, 1) f32; bias: (1,) f32 -> (B, 1) f32."""
    B, f_in = x.shape
    f_out, _ = weight.shape
    assert f_in == 1 and f_out == 1

    n = B * f_in
    aligned = (n % ALIGN == 0)

    if aligned:
        # Fast path: pure bitcast view — no pad / no slice HBM passes.
        padded_n = n
        x2d = x.reshape(padded_n // LANES, LANES)
    else:
        # Pad only to the next (8,128) tile; at most 1023 junk elements.
        padded_n = _round_up(n, ALIGN)
        flat = jnp.pad(x.reshape(-1), (0, padded_n - n))
        x2d = flat.reshape(padded_n // LANES, LANES)

    rows = padded_n // LANES
    tile_rows = _pick_tile_rows(rows)
    # Last block may be partial; Pallas masks out-of-bounds writes, so no
    # padding to a multiple of tile_rows is needed.
    grid = (pl.cdiv(rows, tile_rows),)

    w = weight.reshape(1, 1)
    b = bias.reshape(1, 1)

    out2d = pl.pallas_call(
        scale_bias_kernel,
        out_shape=jax.ShapeDtypeStruct((rows, LANES), x.dtype),
        grid_spec=pltpu.PrefetchScalarGridSpec(
            num_scalar_prefetch=0,
            grid=grid,
            in_specs=[
                pl.BlockSpec((tile_rows, LANES), lambda i: (i, 0)),
                pl.BlockSpec(memory_space=pltpu.MemorySpace.SMEM),  # weight scalar
                pl.BlockSpec(memory_space=pltpu.MemorySpace.SMEM),  # bias scalar
            ],
            out_specs=pl.BlockSpec((tile_rows, LANES), lambda i: (i, 0)),
        ),
        compiler_params=pltpu.CompilerParams(
            dimension_semantics=("parallel",),
            # 4 MiB blocks x 2 arrays x 2 buffers = 16 MiB resident; raise the
            # scoped limit above v5e's 16 MiB default, below v7x's 64 MiB VMEM.
            vmem_limit_bytes=48 * 1024 * 1024,
        ),
    )(x2d, w, b)

    if aligned:
        return out2d.reshape(B, f_out)
    # Unaligned tail: strip lane padding and restore the (B, 1) Linear layout.
    return out2d.reshape(-1)[:n].reshape(B, f_out)


if __name__ == "__main__":
    key = jax.random.PRNGKey(0)
    k_x, k_w, k_b = jax.random.split(key, 3)

    batch = 8
    in_features = 1
    out_features = 1

    # PyTorch-style uniform(-1/sqrt(fan_in), +1/sqrt(fan_in)) init.
    bound = 1.0 / (in_features ** 0.5)
    weight = jax.random.uniform(
        k_w, (out_features, in_features), jnp.float32, -bound, bound
    )
    bias = jax.random.uniform(k_b, (out_features,), jnp.float32, -bound, bound)

    x = jax.random.normal(k_x, (batch, in_features), jnp.float32)

    # Unaligned (padded) path.
    out = feedforward_nn(x, weight, bias)
    out = jax.block_until_ready(out)
    ref = x @ weight.T + bias
    assert out.shape == (batch, out_features)
    assert jnp.allclose(out, ref, atol=1e-5, rtol=1e-5)

    # Aligned fast path (no pad / no slice), still a small shape.
    x_big = jax.random.normal(k_x, (4096, in_features), jnp.float32)
    out_big = jax.block_until_ready(feedforward_nn(x_big, weight, bias))
    ref_big = x_big @ weight.T + bias
    assert out_big.shape == (4096, out_features)
    assert jnp.allclose(out_big, ref_big, atol=1e-5, rtol=1e-5)

    print("KERNEL_OK")
</pallas_src>

<mosaic_0001>
module attributes {stable_mosaic.version = 11 : i64} {
  func.func @scale_bias_kernel(%arg0: i32, %arg1: memref<8x128xf32, #tpu.memory_space<vmem>>, %arg2: memref<1x1xf32, #tpu.memory_space<smem>>, %arg3: memref<1x1xf32, #tpu.memory_space<smem>>, %arg4: memref<8x128xf32, #tpu.memory_space<vmem>>) attributes {dimension_semantics = [#tpu.dimension_semantics<parallel>], iteration_bounds = array<i64: 1>, scalar_prefetch = 0 : i64, scratch_operands = 0 : i64, tpu.core_type = #tpu.core_type<tc>, window_params = [{transform_indices = @transform_0, window_bounds = array<i64: 8, 128>}, {transform_indices = @transform_1, window_bounds = array<i64: 1, 1>}, {transform_indices = @transform_2, window_bounds = array<i64: 1, 1>}, {transform_indices = @transform_3, window_bounds = array<i64: 8, 128>}]} {
    %c0 = arith.constant 0 : index
    %c0_0 = arith.constant 0 : index
    %0 = memref.load %arg2[%c0, %c0_0] : memref<1x1xf32, #tpu.memory_space<smem>>
    %c0_1 = arith.constant 0 : index
    %c0_2 = arith.constant 0 : index
    %1 = memref.load %arg3[%c0_1, %c0_2] : memref<1x1xf32, #tpu.memory_space<smem>>
    %c0_3 = arith.constant 0 : index
    %c0_4 = arith.constant 0 : index
    %2 = vector.load %arg1[%c0_3, %c0_4] : memref<8x128xf32, #tpu.memory_space<vmem>>, vector<8x128xf32>
    %3 = vector.broadcast %0 : f32 to vector<8x128xf32>
    %4 = arith.mulf %2, %3 : vector<8x128xf32>
    %5 = vector.broadcast %1 : f32 to vector<8x128xf32>
    %6 = arith.addf %4, %5 : vector<8x128xf32>
    %c0_5 = arith.constant 0 : index
    %c0_6 = arith.constant 0 : index
    %7 = vector.load %arg4[%c0_5, %c0_6] : memref<8x128xf32, #tpu.memory_space<vmem>>, vector<8x128xf32>
    tpu.vector_store %arg4[%c0_5, %c0_6], %6 {strides = array<i32>} : memref<8x128xf32, #tpu.memory_space<vmem>>, vector<8x128xf32>,
    return
  }
  func.func @transform_0(%arg0: i32) -> (i32, i32) {
    %c0_i32 = arith.constant 0 : i32
    %c0_i32_0 = arith.constant 0 : i32
    return %arg0, %c0_i32 : i32, i32
  }
  func.func @transform_1(%arg0: i32) -> (i32, i32) {
    %c0_i32 = arith.constant 0 : i32
    %c0_i32_0 = arith.constant 0 : i32
    %c0_i32_1 = arith.constant 0 : i32
    return %c0_i32, %c0_i32_0 : i32, i32
  }
  func.func @transform_2(%arg0: i32) -> (i32, i32) {
    %c0_i32 = arith.constant 0 : i32
    %c0_i32_0 = arith.constant 0 : i32
    %c0_i32_1 = arith.constant 0 : i32
    return %c0_i32, %c0_i32_0 : i32, i32
  }
  func.func @transform_3(%arg0: i32) -> (i32, i32) {
    %c0_i32 = arith.constant 0 : i32
    %c0_i32_0 = arith.constant 0 : i32
    return %arg0, %c0_i32 : i32, i32
  }
}

</mosaic_0001>

<bundles_post_ra>
// kernel: feedforward_nn.1
= control target key start
LH: loop header
LB: loop body
LE: loop exit
PB: predicated region body
PF: predicated region fallthrough
CT: control target
= control target key end

     0   :  { %s60_s0 = inlined_call_operand.vmem [shape: f32[8,128], index: 0, kind: input, shape index: {}]   ;;  %s61_s1 = inlined_call_operand.<no memory space> [shape: f32[1,1], index: 1, kind: input, shape index: {}]   ;;  %s62_s2 = inlined_call_operand.<no memory space> [shape: f32[1,1], index: 2, kind: input, shape index: {}]   ;;  %s63_s3 = inlined_call_operand.vmem [shape: f32[8,128], index: 3, kind: output, shape index: {}]  }
   0x1   :  { %v18_v0 = vld [vmem:[%s60_s0] sm:$0xff]  ;;  %v19_v1 = vstv %s61_s1  ;;  %v21_v2 = vstv %s62_s2 }
   0x2   :  { %v20_v3 = vmul.f32 %v19_v1, %v18_v0 }
   0x4   :  { %v22_v4 = vadd.f32 %v21_v2, %v20_v3 }
   0x6   :  { %23 = vst [vmem:[%s63_s3] sm:$0xff] %v22_v4 }

</bundles_post_ra>
